<compile_context>
chip_gen: v7x
topology: tpu7x:2x2x1
jax: 0.10.0
libtpu: 0.0.40
codegen_flags: <defaults>
</compile_context>

<pallas_src>
import math

import jax
import jax.numpy as jnp
from jax.experimental import pallas as pl
from jax.experimental.pallas import tpu as pltpu


def _round_up(x, m):
    return ((x + m - 1) // m) * m


def _pad_to(a, shape):
    pads = [(0, t - s) for s, t in zip(a.shape, shape)]
    if any(p for _, p in pads):
        a = jnp.pad(a, pads)
    return a


def _pick_tile(total, target):
    """Largest multiple of 128 <= target that divides `total` (total is a
    multiple of 128).  Returns `total` itself when it already fits `target`.
    Worst case (128 * prime) falls back to 128: correct, just smaller tiles."""
    if total <= target:
        return total
    best = 128
    t = 256
    while t <= target:
        if total % t == 0:
            best = t
        t += 128
    return best


def _vmem_budget_bytes():
    """Per-generation VMEM budget (~75% of physical VMEM).

    v5e/v6e (128 MiB physical) -> ~96 MiB, v7x (64 MiB) -> ~48 MiB.
    Conservative v7x-safe fallback if the query is unavailable."""
    try:
        cap = int(pltpu.get_tpu_info().vmem_capacity_bytes)
    except Exception:
        cap = 64 * 1024 * 1024
    return int(cap * 3 // 4)


# ----------------------------------------------------------------------------
# Pass 1: support = x @ W, folded over the batch into the column dimension.
# ----------------------------------------------------------------------------
def support_kernel(x_ref, w_ref, s_ref):
    """One grid step: (b, s) = (batch element, node-row tile).

    x_ref: (TS, C_in_p)       node rows of tile s for batch b (batch squeezed)
    w_ref: (C_in_p, C_out_p)  full weight (constant index map -> DMA'd once)
    s_ref: (TS, C_out_p)      support tile, stored at column block b
    """
    s_ref[...] = jnp.dot(
        x_ref[...], w_ref[...], preferred_element_type=jnp.float32
    ).astype(s_ref.dtype)


# ----------------------------------------------------------------------------
# Pass 2: out = relu(adj @ support_folded + bias_folded).
# ----------------------------------------------------------------------------
def aggregate_kernel(adj_ref, s_ref, bias_ref, o_ref, acc_ref):
    """One grid step: (i, j, k) = (adj row tile, folded column tile, contraction).

    adj_ref:  (TM, TK)   adjacency tile (read once per (i, k) since n_n is
                         usually 1 after batch folding)
    s_ref:    (TK, TN)   folded support tile (columns = b * C_out_p + c)
    bias_ref: (1, TN)    folded bias row
    o_ref:    (TM, TN)   output tile
    acc_ref:  (TM, TN)   f32 accumulator (VMEM scratch)
    """
    k = pl.program_id(2)
    nk = pl.num_programs(2)

    p = jnp.dot(adj_ref[...], s_ref[...], preferred_element_type=jnp.float32)

    # First partial product is written directly: saves a full (TM, TN) f32
    # zero-store + reload per output tile (vst slot relief on v5e).
    @pl.when(k == 0)
    def _():
        acc_ref[...] = p

    @pl.when(k > 0)
    def _():
        acc_ref[...] += p

    @pl.when(k == nk - 1)
    def _():
        out = acc_ref[...] + bias_ref[...]        # (TM,TN) + (1,TN) broadcast
        o_ref[...] = jnp.maximum(out, 0.0).astype(o_ref.dtype)


def graph_convolution(x, weight, adj, bias=None, *,
                      compute_dtype=jnp.bfloat16,
                      tile_m=None, tile_n=None, tile_k=None):
    """Fused GCN layer: relu(adj @ (x @ weight) + bias).

    x: (B, N, C_in), weight: (C_in, C_out), adj: (N, N), bias: (C_out,) or None.
    """
    B, N, C_in = x.shape
    C_out = weight.shape[1]
    out_dtype = x.dtype

    if bias is None:
        bias = jnp.zeros((C_out,), jnp.float32)

    budget = _vmem_budget_bytes()

    # ---- padding -----------------------------------------------------------
    C_in_p = _round_up(C_in, 128)     # lane-dense x tiles, healthy MXU K
    C_out_p = _round_up(C_out, 128)   # lane-dense support / output columns
    BC = B * C_out_p                  # batch folded into the matmul column dim
    N_p0 = _round_up(N, 128)

    # ---- tile selection ------------------------------------------------------
    # TK (contraction) as large as the per-generation VMEM budget comfortably
    # allows -> fewer accumulator read-modify-write passes (matters most on
    # v5e's single vst slot).  Tiles come from divisors of the 128-rounded node
    # count so N padding stays minimal (no lcm blow-up).
    tk_target = 2048 if budget >= 80 * 1024 * 1024 else 1024
    TM = tile_m if tile_m is not None else _pick_tile(N_p0, 512)
    TK = tile_k if tile_k is not None else _pick_tile(N_p0, tk_target)
    TN = tile_n if tile_n is not None else _pick_tile(BC, 512)
    N_p = _round_up(N_p0, math.lcm(TM, TK))   # == N_p0 for auto-picked tiles
    TS = _pick_tile(N_p, 512)                 # node tile for the support pass
    assert BC % TN == 0 and N_p % TM == 0 and N_p % TK == 0 and N_p % TS == 0

    n_m, n_n, n_k = N_p // TM, BC // TN, N_p // TK

    cd_size = jnp.dtype(compute_dtype).itemsize
    out_size = jnp.dtype(out_dtype).itemsize

    # ---- pad + cast operands (zero padding cannot change valid outputs) ----
    xp = _pad_to(x, (B, N_p, C_in_p)).astype(compute_dtype)
    wp = _pad_to(weight, (C_in_p, C_out_p)).astype(compute_dtype)
    adjp = _pad_to(adj, (N_p, N_p)).astype(compute_dtype)
    bias_p = _pad_to(bias.reshape(1, C_out).astype(jnp.float32), (1, C_out_p))
    bias_folded = jnp.tile(bias_p, (1, B))     # (1, B*C_out_p)

    # ---- pass 1: support = x @ W, folded to (N_p, B*C_out_p) ---------------
    cost1 = pl.CostEstimate(
        flops=2 * B * N_p * C_in_p * C_out_p,
        transcendentals=0,
        bytes_accessed=int(xp.size * cd_size + wp.size * cd_size
                           + N_p * BC * cd_size),
    )
    support = pl.pallas_call(
        support_kernel,
        out_shape=jax.ShapeDtypeStruct((N_p, BC), compute_dtype),
        grid_spec=pltpu.PrefetchScalarGridSpec(
            num_scalar_prefetch=0,
            grid=(B, N_p // TS),
            in_specs=[
                # x rows of node tile s for batch b (batch dim squeezed).
                pl.BlockSpec((None, TS, C_in_p), lambda b, s: (b, s, 0)),
                # Full weight: constant index map -> DMA'd once, then reused.
                pl.BlockSpec((C_in_p, C_out_p), lambda b, s: (0, 0)),
            ],
            out_specs=pl.BlockSpec((TS, C_out_p), lambda b, s: (s, b)),
        ),
        compiler_params=pltpu.CompilerParams(
            dimension_semantics=("parallel", "parallel"),
            vmem_limit_bytes=budget,
        ),
        cost_estimate=cost1,
    )(xp, wp)

    # ---- pass 2: out = relu(adj @ support_folded + bias) -------------------
    # adj streamed n_n times (usually once), support re-read once per row tile
    # (standard tiled-matmul tradeoff, bounded by TM), output written once.
    cost2 = pl.CostEstimate(
        flops=2 * N_p * N_p * BC,
        transcendentals=0,
        bytes_accessed=int(n_n * N_p * N_p * cd_size
                           + n_m * N_p * BC * cd_size
                           + N_p * BC * out_size
                           + BC * 4),
    )
    out_folded = pl.pallas_call(
        aggregate_kernel,
        out_shape=jax.ShapeDtypeStruct((N_p, BC), out_dtype),
        grid_spec=pltpu.PrefetchScalarGridSpec(
            num_scalar_prefetch=0,
            grid=(n_m, n_n, n_k),
            in_specs=[
                pl.BlockSpec((TM, TK), lambda i, j, k: (i, k)),   # adj tile
                pl.BlockSpec((TK, TN), lambda i, j, k: (k, j)),   # support tile
                pl.BlockSpec((1, TN), lambda i, j, k: (0, j)),    # bias row
            ],
            out_specs=pl.BlockSpec((TM, TN), lambda i, j, k: (i, j)),
            scratch_shapes=[pltpu.VMEM((TM, TN), jnp.float32)],   # f32 acc
        ),
        compiler_params=pltpu.CompilerParams(
            # Row and folded-column tiles are independent -> both parallel
            # (v7x: both TensorCores active even when B == 1); the contraction
            # axis carries the accumulator -> arbitrary.
            dimension_semantics=("parallel", "parallel", "arbitrary"),
            vmem_limit_bytes=budget,
        ),
        cost_estimate=cost2,
    )(adjp, support, bias_folded)

    # Unfold the batch from the column dim and strip padding.  (Padded rows
    # hold relu(bias); they are discarded here and never exposed.)
    out = out_folded.reshape(N_p, B, C_out_p).transpose(1, 0, 2)
    return out[:, :N, :C_out]


def reference(x, weight, adj, bias):
    support = jnp.einsum("bnc,co->bno", x, weight, precision="highest")
    out = jnp.einsum("nm,bmo->bno", adj, support, precision="highest")
    out = out + bias
    return jnp.maximum(out, 0.0)


if __name__ == "__main__":
    key = jax.random.PRNGKey(0)
    kx, kw, kb, ka, kx2, ka2, kx3 = jax.random.split(key, 7)

    # Small shapes consistent with the module's forward: (b, n, c_in) input.
    B, N, C_in, C_out = 2, 8, 16, 32

    # Deterministic parameter init mirroring reset_parameters():
    # uniform(-stdv, stdv) with stdv = 1/sqrt(out_features).
    stdv = 1.0 / math.sqrt(C_out)
    weight = jax.random.uniform(kw, (C_in, C_out), jnp.float32, -stdv, stdv)
    bias = jax.random.uniform(kb, (C_out,), jnp.float32, -stdv, stdv)

    # Synthetic adjacency (the module loads it from disk; built in-script):
    # row-normalized random non-negative matrix.
    adj_raw = jax.random.uniform(ka, (N, N), jnp.float32, 0.0, 1.0)
    adj = adj_raw / jnp.sum(adj_raw, axis=-1, keepdims=True)
    x = jax.random.normal(kx, (B, N, C_in), jnp.float32)

    ref = reference(x, weight, adj, bias)

    # 1) Exact-parity path (f32 operands).
    out_f32 = jax.block_until_ready(
        graph_convolution(x, weight, adj, bias, compute_dtype=jnp.float32))
    assert out_f32.shape == (B, N, C_out)
    assert jnp.allclose(out_f32, ref, atol=1e-4, rtol=1e-4)

    # 2) Default fast path (bf16 MXU operands, f32 accumulation).
    out_bf16 = jax.block_until_ready(graph_convolution(x, weight, adj, bias))
    assert out_bf16.shape == (B, N, C_out)
    assert jnp.allclose(out_bf16, ref, atol=3e-2, rtol=3e-2)

    # 3) Tiled path (multiple row/column/contraction tiles -> exercises the
    #    k-accumulation, pl.when finalize and column tiling) at a small size.
    N2 = 256
    adj2_raw = jax.random.uniform(ka2, (N2, N2), jnp.float32, 0.0, 1.0)
    adj2 = adj2_raw / jnp.sum(adj2_raw, axis=-1, keepdims=True)
    x2 = jax.random.normal(kx2, (B, N2, C_in), jnp.float32)
    ref2 = reference(x2, weight, adj2, bias)
    out2 = jax.block_until_ready(
        graph_convolution(x2, weight, adj2, bias, compute_dtype=jnp.float32,
                          tile_m=128, tile_k=128, tile_n=128))
    assert out2.shape == (B, N2, C_out)
    assert jnp.allclose(out2, ref2, atol=1e-3, rtol=1e-3)

    # 4) B == 1 path (row tiles are the parallel axis -> both TCs on v7x).
    x3 = jax.random.normal(kx3, (1, N2, C_in), jnp.float32)
    ref3 = reference(x3, weight, adj2, bias)
    out3 = jax.block_until_ready(
        graph_convolution(x3, weight, adj2, bias, compute_dtype=jnp.float32))
    assert out3.shape == (1, N2, C_out)
    assert jnp.allclose(out3, ref3, atol=1e-3, rtol=1e-3)

    # TODO(synk): the module's epoch/max_epochs args and drop_prob /
    # min_drop_prob fields are unused in forward(), so they are not modeled;
    # the adjacency .npy load is replaced by an in-script synthetic matrix.
    print("KERNEL_OK")
</pallas_src>

<mosaic_0001>
module attributes {stable_mosaic.version = 11 : i64} {
  func.func @support_kernel(%arg0: i32, %arg1: i32, %arg2: memref<1x128x128xf32, #tpu.memory_space<vmem>>, %arg3: memref<128x128xf32, #tpu.memory_space<vmem>>, %arg4: memref<128x128xf32, #tpu.memory_space<vmem>>) attributes {dimension_semantics = [#tpu.dimension_semantics<parallel>, #tpu.dimension_semantics<parallel>], iteration_bounds = array<i64: 2, 1>, scalar_prefetch = 0 : i64, scratch_operands = 0 : i64, tpu.core_type = #tpu.core_type<tc>, window_params = [{transform_indices = @transform_0, window_bounds = array<i64: 1, 128, 128>}, {pipeline_mode = #tpu.pipeline_mode<synchronous>, transform_indices = @transform_1, window_bounds = array<i64: 128, 128>}, {transform_indices = @transform_2, window_bounds = array<i64: 128, 128>}]} {
    %c0 = arith.constant 0 : index
    %c0_0 = arith.constant 0 : index
    %c0_1 = arith.constant 0 : index
    %0 = vector.load %arg2[%c0, %c0_0, %c0_1] : memref<1x128x128xf32, #tpu.memory_space<vmem>>, vector<1x128x128xf32>
    %1 = vector.shape_cast %0 : vector<1x128x128xf32> to vector<128x128xf32>
    %c0_2 = arith.constant 0 : index
    %c0_3 = arith.constant 0 : index
    %2 = vector.load %arg3[%c0_2, %c0_3] : memref<128x128xf32, #tpu.memory_space<vmem>>, vector<128x128xf32>
    %cst = arith.constant dense<0.000000e+00> : vector<128x128xf32>
    %3 = tpu.matmul %1, %2, %cst {dimension_numbers = #tpu.dot_dimension_numbers<[1], [0], [0], [1], [0, 0, 1, 1], [], []>} : vector<128x128xf32>, vector<128x128xf32>, vector<128x128xf32> -> vector<128x128xf32>
    %c0_4 = arith.constant 0 : index
    %c0_5 = arith.constant 0 : index
    %4 = vector.load %arg4[%c0_4, %c0_5] : memref<128x128xf32, #tpu.memory_space<vmem>>, vector<128x128xf32>
    tpu.vector_store %arg4[%c0_4, %c0_5], %3 {strides = array<i32>} : memref<128x128xf32, #tpu.memory_space<vmem>>, vector<128x128xf32>,
    return
  }
  func.func @transform_0(%arg0: i32, %arg1: i32) -> (i32, i32, i32) {
    %c0_i32 = arith.constant 0 : i32
    %c0_i32_0 = arith.constant 0 : i32
    return %arg0, %arg1, %c0_i32 : i32, i32, i32
  }
  func.func @transform_1(%arg0: i32, %arg1: i32) -> (i32, i32) {
    %c0_i32 = arith.constant 0 : i32
    %c0_i32_0 = arith.constant 0 : i32
    %c0_i32_1 = arith.constant 0 : i32
    return %c0_i32, %c0_i32_0 : i32, i32
  }
  func.func @transform_2(%arg0: i32, %arg1: i32) -> (i32, i32) {
    %c0_i32 = arith.constant 0 : i32
    return %arg1, %arg0 : i32, i32
  }
}

</mosaic_0001>

<bundles_post_ra>
// kernel: tpu_custom_call.1
= control target key start
LH: loop header
LB: loop body
LE: loop exit
PB: predicated region body
PF: predicated region fallthrough
CT: control target
= control target key end

     0   :  { %7 = vsyncpa [#allocation3], 0  ;;  %s1168_s0 = inlined_call_operand.hbm [shape: f32[2,128,128], index: 0, kind: input, shape index: {}]   ;;  %s1169_s1 = inlined_call_operand.hbm [shape: f32[128,128], index: 1, kind: input, shape index: {}]   ;;  %s1170_s2 = inlined_call_operand.hbm [shape: f32[128,256], index: 2, kind: output, shape index: {}]  }
   0x1   :  { %9 = vsyncpa [#allocation3 + $0x1], 0 }
   0x2   :  { %10 = vsyncpa [#allocation6], 0 }
   0x3   :  { %11 = vsyncpa [#allocation4], 0 }
   0x4   :  { %13 = vsyncpa [#allocation4 + $0x1], 0  ;;  %s902_s9 = smov 0   ;;  %s904_s10 = smov 0  }
   0x5   :  { %s906_s11 = smov 0   ;;  %s908_s12 = smov 0  }
   0x6   :  { %s910_s13 = smov 0   ;;  %s912_s14 = smov 0  }
   0x7 LB: > { %s502_s15 = sadd.s32 4294967295, %s877_s14   ;;  %s503_s16 = sadd.s32 4294967294, %s877_s14   ;;  %s877_s14 = sphi %s912_s14, %s19_s14   ;;  %s873_s13 = sphi %s910_s13, %s1194_s13   ;;  %s869_s12 = sphi %s908_s12, %s1193_s12   ;;  %s865_s11 = sphi %s906_s11, %s1192_s11   ;;  %s861_s10 = sphi %s904_s10, %s1191_s10   ;;  %s857_s9 = sphi %s902_s9, %s1190_s9  }
   0x8   : > { %p53_p0 = scmp.ne.s32.totalorder %s861_s10, %s857_s9  ;;  %p936_p1 = scmp.eq.s32.totalorder %s502_s15, 0 }
   0x9   : > { %p940_p2 = scmp.eq.s32.totalorder %s502_s15, 1  ;;  %p106_p3 = scmp.eq.s32.totalorder %s503_s16, 1 }
   0xa   : > { %s1175_s17 = scalar_select %p936_p1, 1, 0 }
   0xb   : > { %s1176_s18 = scalar_select %p940_p2, 1, 0 }
   0xc   : > { %p946_p4 = por %p936_p1, %p53_p0  ;;  %p504_p5 = scmp.ge.s32.totalorder %s877_s14, 1 }
   0xd   : > { %p951_p6 = por %p106_p3, %p53_p0  ;;  %p113_p7 = scmp.lt.s32.totalorder %s877_s14, 3 }
   0xe   : > { %s1177_s19 = scalar_select %p946_p4, 1, 0 }
   0xf   : > { %s1178_s20 = scalar_select %p951_p6, 1, 0 }
  0x10   : > { %p956_p8 = pnand %p504_p5, %p113_p7  ;;  %s879_s22 = smov [#allocation5]  }
  0x11   : > { %s125_s23 = sshll.u32 %s879_s22, 4  ;;  %s31_s25 = sadd.s32 1, %s873_s13  ;;  %s126_s23 = int_to_ptr.vmem [resolvable:$true] %s125_s23 }
  0x12   : > { %s1179_s21 = scalar_select %p956_p8, 1, 0 }
  0x13   : > { %p663_p9 = pneg %p956_p8  ;;  %s733_s28 = scalar_lea.hbm %s1169_s1, 2048 }
  0x14   : > { %p734_p12 = scmp.ne.s32.totalorder %s1169_s1, %s733_s28  ;;  %p740_p5 = scmp.lt.u32.totalorder %s733_s28, %s1169_s1 }
  0x15   : > { %p965_p11 = pnand %p663_p9, %p936_p1 }
  0x17   : > { %p735_p13 = pneg %p965_p11 }
  0x19   : > { %p736_p0 = pnand %p735_p13, %p734_p12 }
  0x1b   : > { %p737_p3 = pneg %p736_p0 }
  0x1d   : > { %p742_p7 = pnand %p740_p5, %p737_p3 }
  0x1f   : > { %745 = shalt.err (!%p742_p7)
}
  0x20   : > { %s746_s5 = scalar_lea.vmem %s126_s23, 2048  ;;  %p754_p1 = scmp.lt.s32.totalorder %s126_s23, %s126_s23 }
  0x21   : > { %p747_p9 = scmp.ne.s32.totalorder %s126_s23, %s746_s5  ;;  %p755_p4 = scmp.lt.s32.totalorder %s746_s5, %s746_s5 }
  0x23   : > { %p749_p10 = pnand %p747_p9, %p735_p13  ;;  %p756_p8 = por %p755_p4, %p754_p1 }
  0x25   : > { %p750_p6 = pneg %p749_p10 }
  0x27   : > { %p757_p2 = pnand %p756_p8, %p750_p6 }
  0x29   : > { %760 = shalt.err (!%p757_p2)
}
  0x2a   : > { %s880_s6 = smov 128   ;;  %s881_s7 = smov 8  }
  0x2b   : > { %666 = dma.hbm_to_vmem [thread:$0]  (!%p965_p11), %s1169_s1, 2048, %s126_s23, [#allocation6], %s880_s6, %s880_s6, %s881_s7  }
  0x2c   : > { %p33_p1 = scmp.ge.s32.totalorder %s31_s25, 2  ;;  %s40_s16 = sadd.s32 1, %s865_s11 }
  0x2d   : > { %p47_p2 = scmp.ne.s32.totalorder %s865_s11, %s861_s10  ;;  %p48_p4 = scmp.eq.s32.totalorder %s877_s14, 0 }
  0x2e   : > { %s1196_s25 = smov (%p33_p1, %s31_s25), 0  ;;  %p1182_p8 = scmp.ne.s32.totalorder %s1176_s18, 0 }
  0x2f   : > { %p995_p6 = por %p48_p4, %p47_p2  ;;  %s35_s26 = ssub.s32 %s873_s13, %s1196_s25 }
  0x30   : > { %p1001_p10 = por %p1182_p8, %p47_p2  ;;  %p676_p12 = scmp.lt.s32.totalorder %s877_s14, 2 }
  0x31   : > { %p38_p11 = scmp.eq.s32.totalorder %s35_s26, 0  ;;  %s139_s23 = sand.u32 1, %s865_s11  }
  0x32   : > { %s507_s27 = sshll.u32 %s139_s23, 7  ;;  %s518_s29 = sshll.u32 %s873_s13, 11 }
  0x33   : > { %s1010_s28 = scalar_select %p38_p11, %s865_s11, %s40_s16  }
  0x34   : > { %s1016_s4 = scalar_lea.hbm %s1168_s0, %s518_s29  ;;  %s143_s18 = scalar_lea.vmem [#allocation2], %s507_s27 }
  0x35   : > { %s152_s5 = sshll.u32 %s143_s18, 4  ;;  %p1022_p13 = pnand %p676_p12, %p995_p6  ;;  %s1018_s5 = int_to_ptr.vmem [resolvable:$true] %s152_s5 }
  0x36   : > { %s1026_s15 = scalar_lea.sflag [#allocation3], %s139_s23  ;;  %s761_s16 = scalar_lea.hbm %s1016_s4, 2048 }
  0x37   : > { %p762_p0 = scmp.ne.s32.totalorder %s1016_s4, %s761_s16  ;;  %p763_p3 = pneg %p1022_p13 }
  0x38   : > { %s766_s22 = scalar_lea.hbm %s1168_s0, 4096  ;;  %p767_p9 = scmp.lt.u32.totalorder %s1016_s4, %s1168_s0 }
  0x39   : > { %p764_p5 = pnand %p763_p3, %p762_p0  ;;  %p768_p1 = scmp.lt.u32.totalorder %s766_s22, %s761_s16 }
  0x3a   : > { %p770_p4 = scmp.lt.u32.totalorder %s761_s16, %s1016_s4 }
  0x3b   : > { %p765_p7 = pneg %p764_p5  ;;  %p769_p2 = por %p768_p1, %p767_p9 }
  0x3d   : > { %p771_p6 = por %p770_p4, %p769_p2 }
  0x3f   : > { %p772_p8 = pnand %p771_p6, %p765_p7 }
  0x41   : > { %775 = shalt.err (!%p772_p8)
}
  0x42   : > { %s776_s23 = scalar_lea.vmem %s1018_s5, 2048  ;;  %s882_s3 = smov [#allocation2]  }
  0x43   : > { %p777_p12 = scmp.ne.s32.totalorder %s1018_s5, %s776_s23  ;;  %s781_s18 = sshll.u32 %s882_s3, 4  ;;  %s782_s18 = int_to_ptr.vmem [resolvable:$false] %s781_s18 }
  0x44   : > { %s783_s26 = scalar_lea.vmem %s782_s18, 4096  ;;  %p784_p5 = scmp.lt.s32.totalorder %s1018_s5, %s782_s18 }
  0x45   : > { %p779_p11 = pnand %p777_p12, %p763_p3  ;;  %p785_p9 = scmp.lt.s32.totalorder %s783_s26, %s776_s23 }
  0x47   : > { %p780_p0 = pneg %p779_p11  ;;  %p786_p1 = por %p785_p9, %p784_p5 }
  0x49   : > { %p787_p2 = pnand %p786_p1, %p780_p0 }
  0x4b   : > { %790 = shalt.err (!%p787_p2)
}
  0x4c   : > { %670 = dma.hbm_to_vmem [thread:$0]  (!%p1022_p13), %s1016_s4, 2048, %s1018_s5, %s1026_s15, %s880_s6, %s880_s6, %s881_s7  }
  0x4d   : > { %p1185_p3 = scmp.ne.s32.totalorder %s1179_s21, 0 }
  0x4e   : > { %s1060_s16 = sand.u32 (!%p1185_p3), 1, %s861_s10   ;;  %p1186_p7 = scmp.ne.s32.totalorder (!%p1185_p3), %s1177_s19, 0 }
  0x4f   : > { %164 = sbr.rel (%p1185_p3) target bundleno = 366 (0x16e), region = 28  ;;  %s511_s27 = sshll.u32 (!%p1185_p3), %s1060_s16, 7 }
  0x50   : > { %s167_s22 = scalar_lea.sflag (!%p1185_p3), [#allocation3], %s1060_s16  ;;  %s1066_s8 = scalar_lea.vmem (!%p1185_p3), [#allocation2], %s511_s27 }
  0x56   : > { %844 = dma.done.wait (%p1186_p7), %s167_s22, 2048  }
  0x57   : > { %846 = vsyncadd (%p1186_p7), %s167_s22, 4294965248  ;;  %p1187_p13 = scmp.ne.s32.totalorder %s1175_s17, 0 }
  0x59   : > { %848 = dma.done.wait (%p1187_p13), [#allocation6], 2048  }
  0x5a   : > { %850 = vsyncadd (%p1187_p13), [#allocation6], 4294965248  ;;  %v213_v0 = vld [vmem:[#allocation5] sm:$0xff]  ;;  %v214_v1 = vld [vmem:[#allocation5 + $0x8] sm:$0xff]  ;;  %s1094_s17 = scalar_lea.vmem [#allocation7], %s511_s27  ;;  %s515_s19 = sshll.u32 %s869_s12, 7 }
  0x5b   : > { %v215_v2 = vld [vmem:[#allocation5 + $0x10] sm:$0xff]  ;;  %v607_v3 = vpack.c.bf16 %v214_v1, %v213_v0  ;;  %v216_v4 = vld [vmem:[#allocation5 + $0x18] sm:$0xff]  ;;  %v217_v6 = vld [vmem:[#allocation5 + $0x20] sm:$0xff]  ;;  %s406_s21 = sshll.u32 %s1094_s17, 4  ;;  %s1113_s4 = scalar_lea.hbm %s1170_s2, %s515_s19  ;;  %s1115_s21 = int_to_ptr.vmem [resolvable:$true] %s406_s21 }
  0x5c   : > { %v611_v5 = vpack.c.bf16 %v216_v4, %v215_v2  ;;  %v218_v7 = vld [vmem:[#allocation5 + $0x28] sm:$0xff]  ;;  %v197_v9 = vld [vmem:[%s1066_s8] sm:$0xff]  ;;  %v219_v11 = vld [vmem:[#allocation5 + $0x30] sm:$0xff]  ;;  %s391_s12 = scalar_lea.sflag [#allocation4], %s1060_s16  ;;  %s791_s5 = scalar_lea.vmem %s1115_s21, 2048 }
  0x5d   : > { %608 = vmatprep.subr.bf16.mxu0 %v607_v3  ;;  %639 = vmatprep.subr.bf16.mxu1 %v607_v3  ;;  %v615_v8 = vpack.c.bf16 %v218_v7, %v217_v6  ;;  %v205_v10 = vld [vmem:[%s1066_s8 + $0x40] sm:$0xff]  ;;  %v220_v12 = vld [vmem:[#allocation5 + $0x38] sm:$0xff]  ;;  %v222_v15 = vld [vmem:[#allocation5 + $0x48] sm:$0xff]  ;;  %p792_p4 = scmp.ne.s32.totalorder %s1115_s21, %s791_s5  ;;  %s883_s15 = smov [#allocation7]  }
  0x5e   : > { %610 = vmatpush3.bf16.msra.mxu0 %v607_v3  ;;  %647 = vmatpush3.bf16.msra.mxu1 %v607_v3  ;;  %v619_v13 = vpack.c.bf16 %v220_v12, %v219_v11  ;;  %v221_v14 = vld [vmem:[#allocation5 + $0x40] sm:$0xff]  ;;  %v223_v17 = vld [vmem:[#allocation5 + $0x50] sm:$0xff]  ;;  %v224_v18 = vld [vmem:[#allocation5 + $0x58] sm:$0xff]  ;;  %s795_s29 = sshll.u32 %s883_s15, 4  ;;  %s796_s29 = int_to_ptr.vmem [resolvable:$false] %s795_s29 }
  0x5f   : > { %612 = vmatprep.subr.bf16.mxu0 %v611_v5  ;;  %640 = vmatprep.subr.bf16.mxu1 %v611_v5  ;;  %v623_v16 = vpack.c.bf16 %v222_v15, %v221_v14  ;;  %v627_v19 = vpack.c.bf16 %v224_v18, %v223_v17  ;;  %v225_v20 = vld [vmem:[#allocation5 + $0x60] sm:$0xff]  ;;  %v226_v21 = vld [vmem:[#allocation5 + $0x68] sm:$0xff]  ;;  %v227_v23 = vld [vmem:[#allocation5 + $0x70] sm:$0xff]  ;;  %p793_p6 = pnand %p792_p4, %p1001_p10  ;;  %s797_s30 = scalar_lea.vmem %s796_s29, 4096 }
  0x60   : > { %583 = vmatprep.mubr.f32.mxu0 %v197_v9  ;;  %595 = vmatprep.mubr.f32.mxu1 %v205_v10  ;;  %v631_v22 = vpack.c.bf16 %v226_v21, %v225_v20  ;;  %v228_v24 = vld [vmem:[#allocation5 + $0x78] sm:$0xff]  ;;  %v198_v26 = vld [vmem:[%s1066_s8 + $0x8] sm:$0xff]  ;;  %v199_v28 = vld [vmem:[%s1066_s8 + $0x10] sm:$0xff]  ;;  %p798_p12 = scmp.lt.s32.totalorder %s1115_s21, %s796_s29  ;;  %p799_p11 = scmp.lt.s32.totalorder %s797_s30, %s791_s5 }
  0x61   : > { %v635_v25 = vpack.c.bf16 %v228_v24, %v227_v23  ;;  %v206_v27 = vld [vmem:[%s1066_s8 + $0x48] sm:$0xff]  ;;  %v207_v29 = vld [vmem:[%s1066_s8 + $0x50] sm:$0xff]  ;;  %v200_v30 = vld [vmem:[%s1066_s8 + $0x18] sm:$0xff]  ;;  %p794_p8 = pneg %p793_p6 }
  0x62   : > { %614 = vmatpush3.bf16.msra.mxu0 %v611_v5  ;;  %648 = vmatpush3.bf16.msra.mxu1 %v611_v5  ;;  %v208_v31 = vld [vmem:[%s1066_s8 + $0x58] sm:$0xff]  ;;  %v201_v32 = vld [vmem:[%s1066_s8 + $0x20] sm:$0xff]  ;;  %v202_v34 = vld [vmem:[%s1066_s8 + $0x28] sm:$0xff]  ;;  %p800_p0 = por %p799_p11, %p798_p12 }
  0x63   : > { %616 = vmatprep.subr.bf16.mxu0 %v615_v8  ;;  %641 = vmatprep.subr.bf16.mxu1 %v615_v8  ;;  %v209_v33 = vld [vmem:[%s1066_s8 + $0x60] sm:$0xff]  ;;  %v210_v35 = vld [vmem:[%s1066_s8 + $0x68] sm:$0xff]  ;;  %v203_v36 = vld [vmem:[%s1066_s8 + $0x30] sm:$0xff] }
  0x64   : > { %v211_v37 = vld [vmem:[%s1066_s8 + $0x70] sm:$0xff]  ;;  %v204_v38 = vld [vmem:[%s1066_s8 + $0x38] sm:$0xff]  ;;  %p801_p5 = pnand %p800_p0, %p794_p8 }
  0x65   : > { %v212_v39 = vld [vmem:[%s1066_s8 + $0x78] sm:$0xff] }
  0x66   : > { %618 = vmatpush3.bf16.msra.mxu0 %v615_v8  ;;  %649 = vmatpush3.bf16.msra.mxu1 %v615_v8 }
  0x67   : > { %620 = vmatprep.subr.bf16.mxu0 %v619_v13  ;;  %642 = vmatprep.subr.bf16.mxu1 %v619_v13 }
  0x6a   : > { %622 = vmatpush3.bf16.msra.mxu0 %v619_v13  ;;  %650 = vmatpush3.bf16.msra.mxu1 %v619_v13 }
  0x6b   : > { %624 = vmatprep.subr.bf16.mxu0 %v623_v16  ;;  %643 = vmatprep.subr.bf16.mxu1 %v623_v16 }
  0x6e   : > { %626 = vmatpush3.bf16.msra.mxu0 %v623_v16  ;;  %651 = vmatpush3.bf16.msra.mxu1 %v623_v16 }
  0x6f   : > { %628 = vmatprep.subr.bf16.mxu0 %v627_v19  ;;  %644 = vmatprep.subr.bf16.mxu1 %v627_v19 }
  0x72   : > { %630 = vmatpush3.bf16.msra.mxu0 %v627_v19  ;;  %652 = vmatpush3.bf16.msra.mxu1 %v627_v19 }
  0x73   : > { %632 = vmatprep.subr.bf16.mxu0 %v631_v22  ;;  %645 = vmatprep.subr.bf16.mxu1 %v631_v22 }
  0x76   : > { %634 = vmatpush3.bf16.msra.mxu0 %v631_v22  ;;  %653 = vmatpush3.bf16.msra.mxu1 %v631_v22 }
  0x77   : > { %636 = vmatprep.subr.bf16.mxu0 %v635_v25  ;;  %646 = vmatprep.subr.bf16.mxu1 %v635_v25 }
  0x7a   : > { %638 = vmatpush3.bf16.msra.mxu0 %v635_v25  ;;  %654 = vmatpush3.bf16.msra.mxu1 %v635_v25 }
  0x7d   : > { %584 = vmatmul.mubr.f32.vlgmr.msra.gmra.mrb[0].mxu0 %v198_v26  ;;  %596 = vmatmul.mubr.f32.vlgmr.msra.gmra.mrb[0].mxu1 %v206_v27 }
  0x7e   : > { %586 = vmatprep.mubr.f32.mxu0 %v199_v28  ;;  %598 = vmatprep.mubr.f32.mxu1 %v207_v29 }
  0x81   : > { %587 = vmatmul.mubr.f32.gmra.mrb[2].mxu0 %v200_v30  ;;  %599 = vmatmul.mubr.f32.gmra.mrb[2].mxu1 %v208_v31 }
  0x82   : > { %589 = vmatprep.mubr.f32.mxu0 %v201_v32  ;;  %601 = vmatprep.mubr.f32.mxu1 %v209_v33 }
  0x85   : > { %590 = vmatmul.mubr.f32.gmra.mrb[4].mxu0 %v202_v34  ;;  %602 = vmatmul.mubr.f32.gmra.mrb[4].mxu1 %v210_v35 }
  0x86   : > { %592 = vmatprep.mubr.f32.mxu0 %v203_v36  ;;  %604 = vmatprep.mubr.f32.mxu1 %v211_v37 }
  0x89   : > { %593 = vmatmul.mubr.f32.gmra.mrb[6].mxu0 %v204_v38  ;;  %605 = vmatmul.mubr.f32.gmra.mrb[6].mxu1 %v212_v39 }
 0x150   : > { %v585_v40 = vpop.f32.mrb[0].mxu0  ;;  %v597_v41 = vpop.f32.mrb[0].mxu1 }
 0x151   : > { %375 = vst [vmem:[%s1094_s17 + $0x8] sm:$0xff] %v585_v40  ;;  %383 = vst [vmem:[%s1094_s17 + $0x48] sm:$0xff] %v597_v41  ;;  %v295_v42 = vpop.f32.mrb[1].mxu0  ;;  %v335_v43 = vpop.f32.mrb[1].mxu1 }
 0x152   : > { %374 = vst [vmem:[%s1094_s17] sm:$0xff] %v295_v42  ;;  %382 = vst [vmem:[%s1094_s17 + $0x40] sm:$0xff] %v335_v43 }
 0x154   : > { %v588_v44 = vpop.f32.mrb[2].mxu0  ;;  %v600_v45 = vpop.f32.mrb[2].mxu1 }
 0x155   : > { %377 = vst [vmem:[%s1094_s17 + $0x18] sm:$0xff] %v588_v44  ;;  %385 = vst [vmem:[%s1094_s17 + $0x58] sm:$0xff] %v600_v45  ;;  %v305_v46 = vpop.f32.mrb[3].mxu0  ;;  %v345_v47 = vpop.f32.mrb[3].mxu1 }
 0x156   : > { %376 = vst [vmem:[%s1094_s17 + $0x10] sm:$0xff] %v305_v46  ;;  %384 = vst [vmem:[%s1094_s17 + $0x50] sm:$0xff] %v345_v47 }
 0x158   : > { %v591_v48 = vpop.f32.mrb[4].mxu0  ;;  %v603_v49 = vpop.f32.mrb[4].mxu1 }
 0x159   : > { %379 = vst [vmem:[%s1094_s17 + $0x28] sm:$0xff] %v591_v48  ;;  %387 = vst [vmem:[%s1094_s17 + $0x68] sm:$0xff] %v603_v49  ;;  %v315_v50 = vpop.f32.mrb[5].mxu0  ;;  %v355_v51 = vpop.f32.mrb[5].mxu1 }
 0x15a   : > { %378 = vst [vmem:[%s1094_s17 + $0x20] sm:$0xff] %v315_v50  ;;  %386 = vst [vmem:[%s1094_s17 + $0x60] sm:$0xff] %v355_v51 }
 0x15c   : > { %v594_v52 = vpop.f32.mrb[6].mxu0  ;;  %v606_v53 = vpop.f32.mrb[6].mxu1 }
 0x15d   : > { %381 = vst [vmem:[%s1094_s17 + $0x38] sm:$0xff] %v594_v52  ;;  %389 = vst [vmem:[%s1094_s17 + $0x78] sm:$0xff] %v606_v53  ;;  %v325_v54 = vpop.f32.mrb[7].mxu0  ;;  %v365_v55 = vpop.f32.mrb[7].mxu1 }
 0x15e   : > { %380 = vst [vmem:[%s1094_s17 + $0x30] sm:$0xff] %v325_v54  ;;  %388 = vst [vmem:[%s1094_s17 + $0x70] sm:$0xff] %v365_v55 }
 0x15f   : > { %804 = shalt.err (!%p801_p5)
}
 0x160   : > { %s805_s23 = scalar_lea.hbm %s1113_s4, 2048  ;;  %s809_s26 = scalar_lea.hbm %s1170_s2, 4096 }
 0x161   : > { %p806_p9 = scmp.ne.s32.totalorder %s1113_s4, %s805_s23  ;;  %p810_p3 = scmp.lt.u32.totalorder %s1113_s4, %s1170_s2 }
 0x162   : > { %p811_p7 = scmp.lt.u32.totalorder %s809_s26, %s805_s23  ;;  %p813_p4 = scmp.lt.u32.totalorder %s805_s23, %s1113_s4 }
 0x163   : > { %p807_p1 = pnand %p806_p9, %p1001_p10 }
 0x164   : > { %p812_p13 = por %p811_p7, %p810_p3 }
 0x165   : > { %p808_p2 = pneg %p807_p1 }
 0x166   : > { %p814_p6 = por %p813_p4, %p812_p13 }
 0x168   : > { %p815_p8 = pnand %p814_p6, %p808_p2 }
 0x16a   : > { %818 = shalt.err (!%p815_p8)
}
 0x16b   : > { %s884_s8 = smov 128   ;;  %s885_s17 = smov 256  }
 0x16c   : > { %s886_s19 = smov 8  }
 0x16d   : > { %661 = dma.vmem_to_hbm [thread:$0]  (%p1001_p10), %s1115_s21, 2048, %s1113_s4, %s391_s12, %s884_s8, %s885_s17, %s886_s19  }
 0x16e PF: > { %s421_s6 = sand.u32 1, %s857_s9   ;;  %p1188_p12 = scmp.ne.s32.totalorder %s1178_s20, 0 }
 0x16f   : > { %p1189_p11 = scmp.ge.s32.totalorder %s877_s14, 2  ;;  %s422_s7 = scalar_lea.sflag [#allocation4], %s421_s6 }
 0x171   : > { %p672_p0 = pnand %p1189_p11, %p1188_p12 }
 0x173   : > { %852 = dma.done.wait (!%p672_p0), %s422_s7, 2048  }
 0x174   : > { %854 = vsyncadd (!%p672_p0), %s422_s7, 4294965248  ;;  %s19_s14 = sadd.s32 1, %s877_s14   ;;  %s1190_s9 = smov %s861_s10 }
 0x175   : > { %p16_p5 = scmp.ge.s32.totalorder %s19_s14, 4   ;;  %s1191_s10 = smov %s865_s11 }
 0x176   : > { %s1192_s11 = smov %s1010_s28  ;;  %s1193_s12 = smov %s873_s13 }
 0x177   : > { %s1194_s13 = smov %s1196_s25  ;;  %18 = sbr.rel (!%p16_p5) target bundleno = 7 (0x7), region = 77 }
 0x17e   :  { %427 = vsyncpa [#allocation3], 1 }
 0x17f   :  { %429 = vsyncpa [#allocation3 + $0x1], 1 }
 0x180   :  { %430 = vsyncpa [#allocation6], 1 }
 0x181   :  { %431 = vsyncpa [#allocation4], 1 }
 0x182   :  { %433 = vsyncpa [#allocation4 + $0x1], 1 }

</bundles_post_ra>
